<compile_context>
chip_gen: v5e
topology: v5e:2x2
jax: 0.10.0
libtpu: 0.0.40
codegen_flags: <defaults>
</compile_context>

<pallas_src>
import functools

import numpy as np

import jax
import jax.numpy as jnp
from jax.experimental import pallas as pl
from jax.experimental.pallas import tpu as pltpu


@functools.lru_cache(maxsize=64)
def _bilinear_weight_matrix_np(in_size: int, out_size: int) -> np.ndarray:
    """Row-stochastic (out_size, in_size) matrix reproducing PyTorch's bilinear
    interpolation with align_corners=False (half-pixel centers, clamp at 0,
    edge clamp) along one axis.  Host-side numpy only (nothing pinned in HBM)."""
    out_idx = np.arange(out_size, dtype=np.float64)
    src = (out_idx + 0.5) * (in_size / out_size) - 0.5
    src = np.maximum(src, 0.0)
    i0 = np.minimum(np.floor(src).astype(np.int64), in_size - 1)
    i1 = np.minimum(i0 + 1, in_size - 1)
    frac = src - i0
    w = np.zeros((out_size, in_size), dtype=np.float64)
    np.add.at(w, (np.arange(out_size), i0), 1.0 - frac)
    np.add.at(w, (np.arange(out_size), i1), frac)
    return w.astype(np.float32)


def _vmem_budget_bytes() -> int:
    """Generation-aware VMEM budget: ~75% of physical VMEM, capped at 96 MiB.
    -> ~96 MiB on v5e/v6e (128 MiB), ~48 MiB on v7x (64 MiB)."""
    cap = None
    get_info = getattr(pltpu, "get_tpu_info", None)
    if get_info is not None:
        try:
            cap = getattr(get_info(), "vmem_capacity_bytes", None)
        except Exception:
            cap = None
    if not cap:
        cap = 64 * 1024 * 1024  # conservative fallback (v7x physical)
    return int(min(cap * 3 // 4, 96 * 1024 * 1024))


def _choose_block_planes(nc, h, h_out, w, w_out, x_itemsize, budget):
    """Pick the plane batch Bc (one block = Bc full (H,W) planes).

    Preferences, in order:
      * fits the VMEM budget (double-buffered in/out blocks + single-buffered
        weights + in-kernel f32 intermediates),
      * grid = nc // Bc is even and >= 4 (>= 2 steps per TensorCore on v7x's
        two-core megacore; >= 2 steps total on v5e/v6e so DMA overlaps compute),
      * the largest such Bc (amortizes the ~0.35 us/step pipeline overhead and
        widens the MXU matmuls).
    """
    def vmem_bytes(bc):
        blocks = 2 * bc * (h * w + h_out * w_out) * x_itemsize        # double-buffered I/O
        weights = (h_out * h + w * w_out) * 4                         # resident weights (f32)
        interm = 4 * bc * (h * w_out + h_out * h + h_out * w_out)     # in-kernel f32 temps
        return blocks + weights + interm

    divisors = [d for d in range(1, nc + 1) if nc % d == 0]
    fitting = [d for d in divisors if vmem_bytes(d) <= budget] or [1]
    preferred = [d for d in fitting if (nc // d) >= 4 and (nc // d) % 2 == 0]
    if preferred:
        return max(preferred)
    two_step = [d for d in fitting if (nc // d) >= 2]
    if two_step:
        return max(two_step)
    return max(fitting)


def _bilinear_kernel(x_ref, wh_ref, wwt_ref, o_ref, *, precision):
    # x_ref  : (Bc, H_in, W_in)   Bc whole image planes
    # wh_ref : (H_out, H_in)      row-interpolation weights (f32)
    # wwt_ref: (W_in, W_out)      column-interpolation weights (transposed)
    # o_ref  : (Bc, H_out, W_out)
    bc, h, w = x_ref.shape
    h_out = wh_ref.shape[0]
    w_out = wwt_ref.shape[1]

    # (1) Column interpolation: fold the plane batch into M of ONE 2-D MXU dot.
    x2 = x_ref[...].reshape(bc * h, w)
    t = jnp.dot(x2, wwt_ref[...],
                precision=precision,
                preferred_element_type=jnp.float32)                 # (Bc*H, W_out), f32

    # (2) Row interpolation: batched matmul over planes (no block-diagonal weights).
    #     The f32 accumulator `t` is kept in f32 here (no downcast before the dot).
    t3 = t.reshape(bc, h, w_out)
    wh_b = jnp.broadcast_to(wh_ref[...][None], (bc, h_out, h))      # small, hoisted once
    out = jnp.einsum("boh,bhv->bov", wh_b, t3,
                     precision=precision,
                     preferred_element_type=jnp.float32)            # (Bc, H_out, W_out)
    o_ref[...] = out.astype(o_ref.dtype)


def interpolate_bilinear(x, scale_factor=2, size=None):
    """Equivalent of Interpolate.forward for mode='bilinear', align_corners=False.

    x: (N, C, H, W) array (NCHW, like PyTorch).
    """
    N, C, H, W = x.shape
    if size is not None:
        H_out, W_out = size
    else:
        H_out, W_out = int(H * scale_factor), int(W * scale_factor)

    nc = N * C
    x_itemsize = jnp.dtype(x.dtype).itemsize

    # bf16 inputs: native bf16 MXU path for the big dot, f32 accumulation throughout.
    # f32 inputs: exact f32 MXU path for parity with PyTorch / jax.image.
    if x.dtype == jnp.bfloat16:
        wwt_dtype, precision = jnp.bfloat16, None
    else:
        wwt_dtype, precision = jnp.float32, jax.lax.Precision.HIGHEST

    budget = _vmem_budget_bytes()
    bc = _choose_block_planes(nc, H, H_out, W, W_out, x_itemsize, budget)
    grid = nc // bc

    wh = jnp.asarray(_bilinear_weight_matrix_np(H, H_out), dtype=jnp.float32)
    wwt = jnp.asarray(_bilinear_weight_matrix_np(W, W_out).T, dtype=wwt_dtype)

    x3 = x.reshape(nc, H, W)  # pure reshape, no data movement

    flops = 2 * nc * H * W * W_out + 2 * nc * H_out * H * W_out
    bytes_accessed = int(nc * H * W * x_itemsize
                         + nc * H_out * W_out * x_itemsize
                         + wh.size * 4
                         + wwt.size * jnp.dtype(wwt_dtype).itemsize)

    def run(single_buffer_weights):
        # Resident (constant index_map) weights: single-buffered when supported.
        wkw = {"pipeline_mode": pl.Buffered(1)} if single_buffer_weights else {}
        call = pl.pallas_call(
            functools.partial(_bilinear_kernel, precision=precision),
            out_shape=jax.ShapeDtypeStruct((nc, H_out, W_out), x.dtype),
            grid=(grid,),
            in_specs=[
                pl.BlockSpec((bc, H, W), lambda i: (i, 0, 0)),
                pl.BlockSpec((H_out, H), lambda i: (0, 0), **wkw),
                pl.BlockSpec((W, W_out), lambda i: (0, 0), **wkw),
            ],
            out_specs=pl.BlockSpec((bc, H_out, W_out), lambda i: (i, 0, 0)),
            compiler_params=pltpu.CompilerParams(
                dimension_semantics=("parallel",),
                vmem_limit_bytes=int(budget)),
            cost_estimate=pl.CostEstimate(
                flops=flops, transcendentals=0, bytes_accessed=bytes_accessed),
        )
        return jax.block_until_ready(call(x3, wh, wwt))

    try:
        out3 = run(True)
    except Exception:
        # pipeline_mode / pl.Buffered unsupported on this jax build: fall back to
        # default double-buffered weights (tiny now that the kron matrix is gone).
        out3 = run(False)

    return out3.reshape(N, C, H_out, W_out)


class Interpolate:
    """Mirror of the PyTorch module (only mode='bilinear', align_corners=False)."""

    def __init__(self, scale_factor=2, size=None, mode="bilinear"):
        if mode != "bilinear":
            # TODO(synk): other interpolation modes (e.g. 'nearest') not implemented.
            raise NotImplementedError("only mode='bilinear' is implemented")
        self.scale_factor = scale_factor
        self.size = size

    def __call__(self, x):
        return interpolate_bilinear(x, scale_factor=self.scale_factor, size=self.size)


if __name__ == "__main__":
    key = jax.random.PRNGKey(0)
    N, C, H, W = 2, 4, 16, 16
    x = jax.random.normal(key, (N, C, H, W), dtype=jnp.float32)

    interp = Interpolate(scale_factor=2)
    y = jax.block_until_ready(interp(x))

    assert y.shape == (N, C, 2 * H, 2 * W), y.shape

    # Sanity check against jax.image.resize (same half-pixel convention as
    # PyTorch align_corners=False for upsampling; antialias irrelevant here).
    y_ref = jax.image.resize(x, (N, C, 2 * H, 2 * W), method="bilinear")
    if not jnp.allclose(y, y_ref, atol=1e-4, rtol=1e-4):
        raise AssertionError("mismatch vs bilinear reference")

    print("KERNEL_OK")
</pallas_src>

<mosaic_0001>
module attributes {stable_mosaic.version = 11 : i64} {
  func.func @_bilinear_kernel(%arg0: i32, %arg1: memref<2x16x16xf32, #tpu.memory_space<vmem>>, %arg2: memref<32x16xf32, #tpu.memory_space<vmem>>, %arg3: memref<16x32xf32, #tpu.memory_space<vmem>>, %arg4: memref<2x32x32xf32, #tpu.memory_space<vmem>>) attributes {dimension_semantics = [#tpu.dimension_semantics<parallel>], iteration_bounds = array<i64: 4>, scalar_prefetch = 0 : i64, scratch_operands = 0 : i64, tpu.core_type = #tpu.core_type<tc>, window_params = [{transform_indices = @transform_0, window_bounds = array<i64: 2, 16, 16>}, {pipeline_mode = #tpu.pipeline_mode<synchronous>, transform_indices = @transform_1, window_bounds = array<i64: 32, 16>}, {pipeline_mode = #tpu.pipeline_mode<synchronous>, transform_indices = @transform_2, window_bounds = array<i64: 16, 32>}, {transform_indices = @transform_3, window_bounds = array<i64: 2, 32, 32>}]} {
    %c0 = arith.constant 0 : index
    %c0_0 = arith.constant 0 : index
    %c0_1 = arith.constant 0 : index
    %0 = vector.load %arg1[%c0, %c0_0, %c0_1] : memref<2x16x16xf32, #tpu.memory_space<vmem>>, vector<2x16x16xf32>
    %1 = vector.shape_cast %0 : vector<2x16x16xf32> to vector<32x16xf32>
    %c0_2 = arith.constant 0 : index
    %c0_3 = arith.constant 0 : index
    %2 = vector.load %arg3[%c0_2, %c0_3] : memref<16x32xf32, #tpu.memory_space<vmem>>, vector<16x32xf32>
    %cst = arith.constant dense<0.000000e+00> : vector<32x32xf32>
    %3 = tpu.matmul %1, %2, %cst {dimension_numbers = #tpu.dot_dimension_numbers<[1], [0], [0], [1], [0, 0, 1, 1], [], []>, precision = #tpu.contract_precision<fp32>} : vector<32x16xf32>, vector<16x32xf32>, vector<32x32xf32> -> vector<32x32xf32>
    %4 = vector.shape_cast %3 : vector<32x32xf32> to vector<2x16x32xf32>
    %c0_4 = arith.constant 0 : index
    %c0_5 = arith.constant 0 : index
    %5 = vector.load %arg2[%c0_4, %c0_5] : memref<32x16xf32, #tpu.memory_space<vmem>>, vector<32x16xf32>
    %6 = vector.shape_cast %5 : vector<32x16xf32> to vector<1x32x16xf32>
    %7 = vector.shape_cast %6 : vector<1x32x16xf32> to vector<1x32x16xf32>
    %8 = vector.broadcast %7 : vector<1x32x16xf32> to vector<2x32x16xf32>
    "tpu.trace_start"() <{level = 10 : i32, message = "boh,bhv->bov"}> : () -> ()
    %cst_6 = arith.constant dense<0.000000e+00> : vector<2x32x32xf32>
    %9 = tpu.matmul %8, %4, %cst_6 {dimension_numbers = #tpu.dot_dimension_numbers<[2], [1], [1], [2], [0, 0, 0, 1, 1, 2], [0], [0]>, precision = #tpu.contract_precision<fp32>} : vector<2x32x16xf32>, vector<2x16x32xf32>, vector<2x32x32xf32> -> vector<2x32x32xf32>
    "tpu.trace_stop"() : () -> ()
    %c0_7 = arith.constant 0 : index
    %c0_8 = arith.constant 0 : index
    %c0_9 = arith.constant 0 : index
    %10 = vector.load %arg4[%c0_7, %c0_8, %c0_9] : memref<2x32x32xf32, #tpu.memory_space<vmem>>, vector<2x32x32xf32>
    tpu.vector_store %arg4[%c0_7, %c0_8, %c0_9], %9 {strides = array<i32>} : memref<2x32x32xf32, #tpu.memory_space<vmem>>, vector<2x32x32xf32>,
    return
  }
  func.func @transform_0(%arg0: i32) -> (i32, i32, i32) {
    %c0_i32 = arith.constant 0 : i32
    %c0_i32_0 = arith.constant 0 : i32
    %c0_i32_1 = arith.constant 0 : i32
    return %arg0, %c0_i32, %c0_i32_0 : i32, i32, i32
  }
  func.func @transform_1(%arg0: i32) -> (i32, i32) {
    %c0_i32 = arith.constant 0 : i32
    %c0_i32_0 = arith.constant 0 : i32
    %c0_i32_1 = arith.constant 0 : i32
    return %c0_i32, %c0_i32_0 : i32, i32
  }
  func.func @transform_2(%arg0: i32) -> (i32, i32) {
    %c0_i32 = arith.constant 0 : i32
    %c0_i32_0 = arith.constant 0 : i32
    %c0_i32_1 = arith.constant 0 : i32
    return %c0_i32, %c0_i32_0 : i32, i32
  }
  func.func @transform_3(%arg0: i32) -> (i32, i32, i32) {
    %c0_i32 = arith.constant 0 : i32
    %c0_i32_0 = arith.constant 0 : i32
    %c0_i32_1 = arith.constant 0 : i32
    return %arg0, %c0_i32, %c0_i32_0 : i32, i32, i32
  }
}

module attributes {stable_mosaic.version = 11 : i64} {
  func.func @_bilinear_kernel(%arg0: i32, %arg1: memref<2x16x16xf32, #tpu.memory_space<vmem>>, %arg2: memref<32x16xf32, #tpu.memory_space<vmem>>, %arg3: memref<16x32xf32, #tpu.memory_space<vmem>>, %arg4: memref<2x32x32xf32, #tpu.memory_space<vmem>>) attributes {dimension_semantics = [#tpu.dimension_semantics<parallel>], iteration_bounds = array<i64: 4>, scalar_prefetch = 0 : i64, scratch_operands = 0 : i64, tpu.core_type = #tpu.core_type<tc>, window_params = [{transform_indices = @transform_0, window_bounds = array<i64: 2, 16, 16>}, {pipeline_mode = #tpu.pipeline_mode<synchronous>, transform_indices = @transform_1, window_bounds = array<i64: 32, 16>}, {pipeline_mode = #tpu.pipeline_mode<synchronous>, transform_indices = @transform_2, window_bounds = array<i64: 16, 32>}, {transform_indices = @transform_3, window_bounds = array<i64: 2, 32, 32>}]} {
    %c0 = arith.constant 0 : index
    %c0_0 = arith.constant 0 : index
    %c0_1 = arith.constant 0 : index
    %0 = vector.load %arg1[%c0, %c0_0, %c0_1] : memref<2x16x16xf32, #tpu.memory_space<vmem>>, vector<2x16x16xf32>
    %1 = vector.shape_cast %0 : vector<2x16x16xf32> to vector<32x16xf32>
    %c0_2 = arith.constant 0 : index
    %c0_3 = arith.constant 0 : index
    %2 = vector.load %arg3[%c0_2, %c0_3] : memref<16x32xf32, #tpu.memory_space<vmem>>, vector<16x32xf32>
    %cst = arith.constant dense<0.000000e+00> : vector<32x32xf32>
    %3 = tpu.matmul %1, %2, %cst {dimension_numbers = #tpu.dot_dimension_numbers<[1], [0], [0], [1], [0, 0, 1, 1], [], []>, precision = #tpu.contract_precision<fp32>} : vector<32x16xf32>, vector<16x32xf32>, vector<32x32xf32> -> vector<32x32xf32>
    %4 = vector.shape_cast %3 : vector<32x32xf32> to vector<2x16x32xf32>
    %c0_4 = arith.constant 0 : index
    %c0_5 = arith.constant 0 : index
    %5 = vector.load %arg2[%c0_4, %c0_5] : memref<32x16xf32, #tpu.memory_space<vmem>>, vector<32x16xf32>
    %6 = vector.shape_cast %5 : vector<32x16xf32> to vector<1x32x16xf32>
    %7 = vector.shape_cast %6 : vector<1x32x16xf32> to vector<1x32x16xf32>
    %8 = vector.broadcast %7 : vector<1x32x16xf32> to vector<2x32x16xf32>
    "tpu.trace_start"() <{level = 10 : i32, message = "boh,bhv->bov"}> : () -> ()
    %cst_6 = arith.constant dense<0.000000e+00> : vector<2x32x32xf32>
    %9 = tpu.matmul %8, %4, %cst_6 {dimension_numbers = #tpu.dot_dimension_numbers<[2], [1], [1], [2], [0, 0, 0, 1, 1, 2], [0], [0]>, precision = #tpu.contract_precision<fp32>} : vector<2x32x16xf32>, vector<2x16x32xf32>, vector<2x32x32xf32> -> vector<2x32x32xf32>
    "tpu.trace_stop"() : () -> ()
    %c0_7 = arith.constant 0 : index
    %c0_8 = arith.constant 0 : index
    %c0_9 = arith.constant 0 : index
    %10 = vector.load %arg4[%c0_7, %c0_8, %c0_9] : memref<2x32x32xf32, #tpu.memory_space<vmem>>, vector<2x32x32xf32>
    tpu.vector_store %arg4[%c0_7, %c0_8, %c0_9], %9 {strides = array<i32>} : memref<2x32x32xf32, #tpu.memory_space<vmem>>, vector<2x32x32xf32>,
    return
  }
  func.func @transform_0(%arg0: i32) -> (i32, i32, i32) {
    %c0_i32 = arith.constant 0 : i32
    %c0_i32_0 = arith.constant 0 : i32
    %c0_i32_1 = arith.constant 0 : i32
    return %arg0, %c0_i32, %c0_i32_0 : i32, i32, i32
  }
  func.func @transform_1(%arg0: i32) -> (i32, i32) {
    %c0_i32 = arith.constant 0 : i32
    %c0_i32_0 = arith.constant 0 : i32
    %c0_i32_1 = arith.constant 0 : i32
    return %c0_i32, %c0_i32_0 : i32, i32
  }
  func.func @transform_2(%arg0: i32) -> (i32, i32) {
    %c0_i32 = arith.constant 0 : i32
    %c0_i32_0 = arith.constant 0 : i32
    %c0_i32_1 = arith.constant 0 : i32
    return %c0_i32, %c0_i32_0 : i32, i32
  }
  func.func @transform_3(%arg0: i32) -> (i32, i32, i32) {
    %c0_i32 = arith.constant 0 : i32
    %c0_i32_0 = arith.constant 0 : i32
    %c0_i32_1 = arith.constant 0 : i32
    return %arg0, %c0_i32, %c0_i32_0 : i32, i32, i32
  }
}

</mosaic_0001>

<bundles_post_ra>
// kernel: tpu_custom_call.1
= control target key start
LH: loop header
LB: loop body
LE: loop exit
PB: predicated region body
PF: predicated region fallthrough
CT: control target
= control target key end

     0   :  { %8 = vsyncpa [#allocation3], 0  ;;  %s1542_s0 = inlined_call_operand.hbm [shape: f32[8,16,16], index: 0, kind: input, shape index: {}]   ;;  %s1543_s1 = inlined_call_operand.vmem [shape: f32[32,16], index: 1, kind: input, shape index: {}]   ;;  %s1544_s2 = inlined_call_operand.vmem [shape: f32[16,32], index: 2, kind: input, shape index: {}]   ;;  %s1545_s3 = inlined_call_operand.hbm [shape: f32[8,32,32], index: 3, kind: output, shape index: {}]  }
   0x1   :  { %10 = vsyncpa [#allocation3 + $0x1], 0 }
   0x2   :  { %11 = vsyncpa [#allocation4], 0 }
   0x3   :  { %13 = vsyncpa [#allocation4 + $0x1], 0  ;;  %s1280_s12 = smov 0   ;;  %s1282_s13 = smov 0  }
   0x4   :  { %s1284_s14 = smov 0   ;;  %s1286_s15 = smov 0  }
   0x5 LB: > { %s1301_s16 = sadd.s32 4294967295, %s1254_s15   ;;  %s1084_s17 = sadd.s32 4294967294, %s1254_s15   ;;  %s1254_s15 = sphi %s1286_s15, %s1554_s15   ;;  %s1250_s14 = sphi %s1284_s14, %s1553_s14   ;;  %s1246_s13 = sphi %s1282_s13, %s1552_s13   ;;  %s1242_s12 = sphi %s1280_s12, %s1551_s12  }
   0x6   : > { %s1305_s18 = sadd.s32 1, %s1254_s15   ;;  %s26_s19 = sadd.s32 1, %s1250_s14 }
   0x7   : > { %s23_s20 = ssub.s32 %s1254_s15, %s1305_s18  ;;  %p33_p0 = scmp.ne.s32.totalorder %s1250_s14, %s1246_s13 }
   0x8   : > { %p24_p1 = scmp.eq.s32.totalorder %s23_s20, 0  ;;  %p34_p2 = scmp.eq.s32.totalorder %s1254_s15, 0 }
   0x9   : > { %p39_p3 = scmp.ne.s32.totalorder %s1246_s13, %s1242_s12  ;;  %p40_p4 = scmp.eq.s32.totalorder %s1301_s16, 0 }
   0xa   : > { %s1317_s21 = scalar_select %p24_p1, %s1250_s14, %s26_s19  }
   0xb   : > { %p1319_p5 = por %p34_p2, %p33_p0  ;;  %p1323_p6 = por %p40_p4, %p39_p3 }
   0xc   : > { %p105_p7 = scmp.eq.s32.totalorder %s1301_s16, 3  ;;  %p111_p8 = scmp.eq.s32.totalorder %s1084_s17, 3 }
   0xd   : > { %p1120_p9 = scmp.lt.s32.totalorder %s1254_s15, 4  ;;  %s137_s26 = sand.u32 1, %s1250_s14  }
   0xe   : > { %p1329_p10 = por %p105_p7, %p33_p0  ;;  %p1333_p11 = por %p111_p8, %p39_p3 }
   0xf   : > { %s1101_s27 = sshll.u32 %s1254_s15, 5  ;;  %s1087_s28 = sshll.u32 %s137_s26, 5 }
  0x10   : > { %s147_s4 = scalar_lea.hbm %s1542_s0, %s1101_s27  ;;  %s141_s6 = scalar_lea.vmem [#allocation2], %s1087_s28 }
  0x11   : > { %s148_s5 = sshll.u32 %s147_s4, 4  ;;  %s150_s7 = sshll.u32 %s141_s6, 4  ;;  %s149_s5 = int_to_ptr.hbm [resolvable:$true] %s148_s5  ;;  %s151_s7 = int_to_ptr.vmem [resolvable:$true] %s150_s7 }
  0x12   : > { %p1344_p12 = pnand %p1120_p9, %p1319_p5  ;;  %p1091_p13 = scmp.ge.s32.totalorder %s1254_s15, 1 }
  0x13   : > { %p158_p0 = scmp.lt.s32.totalorder %s1254_s15, 5  ;;  %s138_s9 = scalar_lea.sflag [#allocation3], %s137_s26 }
  0x14   : > { %s1158_s10 = sshra.s32 %s149_s5, 4  ;;  %p1162_p2 = pneg %p1344_p12  ;;  %s1159_s10 = int_to_ptr.hbm [resolvable:$true] %s1158_s10 }
  0x15   : > { %s1160_s11 = scalar_lea.hbm %s1159_s10, 32  ;;  %s1165_s20 = scalar_lea.hbm %s1542_s0, 128 }
  0x16   : > { %p1161_p1 = scmp.ne.s32.totalorder %s1159_s10, %s1160_s11  ;;  %p1166_p5 = scmp.lt.s32.totalorder %s1159_s10, %s1542_s0 }
  0x17   : > { %p1167_p7 = scmp.lt.s32.totalorder %s1165_s20, %s1160_s11 }
  0x18   : > { %p1163_p3 = pnand %p1162_p2, %p1161_p1 }
  0x19   : > { %p1168_p8 = por %p1167_p7, %p1166_p5 }
  0x1a   : > { %p1164_p4 = pneg %p1163_p3 }
  0x1c   : > { %p1169_p9 = pnand %p1168_p8, %p1164_p4 }
  0x1e   : > { %1172 = shalt.err (!%p1169_p9)
}
  0x1f   : > { %s1256_s26 = smov 128   ;;  %s1257_s28 = smov 8  }
  0x20   : > { %1115 = dma.hbm_to_vmem [thread:$0]  (!%p1344_p12), %s149_s5, 512, %s151_s7, %s138_s9, %s1256_s26, %s1256_s26, %s1257_s28  }
  0x21   : > { %p159_p1 = pnand %p1091_p13, %p158_p0 }
  0x22   : > { %s1365_s29 = sand.u32 (!%p159_p1), 1, %s1246_s13  }
  0x23   : > { %162 = sbr.rel (%p159_p1) target bundleno = 463 (0x1cf), region = 32  ;;  %s1092_s30 = sshll.u32 (!%p159_p1), %s1365_s29, 5 }
  0x24   : > { %s165_s4 = scalar_lea.sflag (!%p159_p1), [#allocation3], %s1365_s29  ;;  %s168_s6 = scalar_lea.vmem (!%p159_p1), [#allocation2], %s1092_s30 }
  0x28   : > { %1233 = dma.done.wait (%p1323_p6), %s165_s4, 512  }
  0x29   : > { %1235 = vsyncadd (%p1323_p6), %s165_s4, 4294966784  ;;  %vm200_vm0 = vcmask 130048   ;;  %v199_v0 = vld [vmem:[%s1544_s2 + $0x8] sm:$0xff]  ;;  %v198_v1 = vld [vmem:[%s1544_s2] sm:$0xff]  ;;  %s1093_s26 = sshll.u32 %s1365_s29, 6  ;;  %vm985_vm1 = vcmask 261120  }
  0x2a   : > { %v196_v2 = vld [vmem:[%s168_s6 + $0x10] sm:$0xff]  ;;  %v227_v3 = vand.u32 4294901760, %v199_v0  ;;  %v229_v4 = vand.u32 4294901760, %v198_v1  ;;  %v197_v6 = vld [vmem:[%s168_s6 + $0x18] sm:$0xff]  ;;  %v194_v7 = vld [vmem:[%s168_s6] sm:$0xff]  ;;  %s1491_s28 = scalar_lea.vmem [#allocation5], %s1093_s26 }
  0x2b   : > { %v208_v5 = vsel %vm200_vm0, %v196_v2, 0  ;;  %v195_v8 = vld [vmem:[%s168_s6 + $0x8] sm:$0xff]  ;;  %v211_v10 = vsel %vm200_vm0, %v197_v6, 0  ;;  %v202_v11 = vsel %vm200_vm0, %v194_v7, 0  ;;  %v465_v49 = vld [vmem:[%s1543_s1] sm:$0xff]  ;;  %s1103_s30 = sshll.u32 %s1301_s16, 6 }
  0x2c   : > { %v1380_v9 = vand.u32 4294901760, %v208_v5  ;;  %v205_v12 = vsel %vm200_vm0, %v195_v8, 0  ;;  %1104 = vmatpush.msra.mxu2 %v227_v3  ;;  %v279_v13 = vsub.f32 %v199_v0, %v227_v3  ;;  %v285_v14 = vsub.f32 %v198_v1, %v229_v4  ;;  %228 = vmatpush.msra.mxu0 %v227_v3  ;;  %v466_v58 = vld [vmem:[%s1543_s1 + $0x8] sm:$0xff]  ;;  %s1007_s5 = scalar_lea.hbm %s1545_s3, %s1103_s30  ;;  %s1008_s7 = sshll.u32 %s1491_s28, 4  ;;  %s1009_s7 = int_to_ptr.vmem [resolvable:$true] %s1008_s7 }
  0x2d   : > { %v255_v15 = vand.u32 4294901760, %v211_v10  ;;  %v231_v16 = vand.u32 4294901760, %v202_v11  ;;  %v239_v18 = vand.u32 4294901760, %v205_v12  ;;  %v470_v52 = vsel %vm200_vm0, %v465_v49, 0  ;;  %s1010_s8 = sshll.u32 %s1007_s5, 4  ;;  %s995_s16 = scalar_lea.sflag [#allocation4], %s1365_s29  ;;  %s1011_s8 = int_to_ptr.hbm [resolvable:$true] %s1010_s8 }
  0x2e   : > { %v248_v17 = vsub.f32 %v208_v5, %v1380_v9  ;;  %1105 = vmatpush.msra.mxu2 %v229_v4  ;;  %v280_v19 = vand.u32 4294901760, %v279_v13  ;;  %v286_v20 = vand.u32 4294901760, %v285_v14  ;;  %230 = vmatpush.msra.mxu0 %v229_v4  ;;  %v1393_v56 = vand.u32 4294901760, %v470_v52  ;;  %s1202_s9 = sshra.s32 %s1011_s8, 4  ;;  %s1208_s17 = scalar_lea.hbm %s1545_s3, 256  ;;  %s1203_s9 = int_to_ptr.hbm [resolvable:$true] %s1202_s9 }
  0x2f   : > { %v256_v21 = vsub.f32 %v211_v10, %v255_v15  ;;  %v232_v22 = vsub.f32 %v202_v11, %v231_v16  ;;  %v240_v24 = vsub.f32 %v205_v12, %v239_v18  ;;  %v473_v0 = vsel %vm200_vm0, %v466_v58, 0  ;;  %s1204_s23 = scalar_lea.hbm %s1203_s9, 64  ;;  %p1209_p0 = scmp.lt.s32.totalorder %s1203_s9, %s1545_s3 }
  0x30   : > { %v249_v23 = vand.u32 4294901760, %v248_v17  ;;  %323 = vmatpush.msrb.mxu2 %v279_v13  ;;  %v281_v25 = vsub.f32 %v279_v13, %v280_v19  ;;  %v287_v26 = vsub.f32 %v285_v14, %v286_v20  ;;  %408 = vmatpush.msrb.mxu0 %v280_v19  ;;  %v1399_v61 = vsub.f32 %v470_v52, %v1393_v56  ;;  %p1205_p6 = scmp.ne.s32.totalorder %s1203_s9, %s1204_s23  ;;  %p1210_p2 = scmp.lt.s32.totalorder %s1208_s17, %s1204_s23 }
  0x31   : > { %v233_v27 = vand.u32 4294901760, %v232_v22  ;;  %v257_v29 = vand.u32 4294901760, %v256_v21  ;;  %v241_v34 = vand.u32 4294901760, %v240_v24  ;;  %v1405_v6 = vand.u32 4294901760, %v473_v0 }
  0x32   : > { %v250_v28 = vsub.f32 %v248_v17, %v249_v23  ;;  %326 = vmatpush.msrb.mxu2 %v285_v14  ;;  %v282_v30 = vand.u32 4294901760, %v281_v25  ;;  %v288_v31 = vand.u32 4294901760, %v287_v26  ;;  %412 = vmatpush.msrb.mxu0 %v286_v20  ;;  %v1403_v5 = vand.u32 4294901760, %v1399_v61  ;;  %p1206_p12 = pnand %p1205_p6, %p1329_p10  ;;  %p1211_p3 = por %p1210_p2, %p1209_p0 }
  0x33   : > { %v234_v32 = vsub.f32 %v232_v22, %v233_v27  ;;  %v258_v36 = vsub.f32 %v256_v21, %v257_v29  ;;  %v242_v37 = vsub.f32 %v240_v24, %v241_v34  ;;  %v1415_v12 = vsub.f32 %v473_v0, %v1405_v6 }
  0x34   : > { %v251_v33 = vand.u32 4294901760, %v250_v28  ;;  %1106 = vmatpush.msra.mxu3 %v282_v30  ;;  %283 = vmatpush.msra.mxu1 %v282_v30  ;;  %v502_v11 = vsub.f32 %v1399_v61, %v1403_v5  ;;  %p1207_p13 = pneg %p1206_p12 }
  0x35   : > { %v235_v35 = vand.u32 4294901760, %v234_v32  ;;  %v259_v38 = vand.u32 4294901760, %v258_v36  ;;  %v243_v39 = vand.u32 4294901760, %v242_v37 }
  0x36   : > { %252 = vmatmul.f32.vlgmr.msra.gmra.mxu2 %v251_v33  ;;  %1107 = vmatpush.msra.mxu3 %v288_v31  ;;  %p1212_p4 = pnand %p1211_p3, %p1207_p13 }
  0x37   : > { %289 = vmatpush.msra.mxu1 %v288_v31  ;;  %299 = vmatmul.f32.vlgmr.msra.gmra.mxu3 %v1380_v9 }
  0x38   : > { %236 = vmatmul.f32.vlgmr.msra.gmra.mxu0 %v235_v35  ;;  %291 = vmatmul.f32.vlgmr.msra.gmra.mxu1 %v231_v16 }
  0x39   : > { %363 = vmatpush.msrb.mxu3 %v227_v3  ;;  %445 = vmatpush.msrb.mxu1 %v227_v3 }
  0x3b   : > { %365 = vmatpush.msrb.mxu3 %v229_v4  ;;  %447 = vmatpush.msrb.mxu1 %v229_v4 }
  0x3e   : > { %260 = vmatmul.f32.gmra.mxu2 %v259_v38 }
  0x3f   : > { %303 = vmatmul.f32.gmra.mxu3 %v255_v15 }
  0x40   : > { %244 = vmatmul.f32.gmra.mxu0 %v243_v39  ;;  %295 = vmatmul.f32.gmra.mxu1 %v239_v18 }
  0x46   : > { %329 = vmatmul.f32.vlgmr.msrb.gmra.mxu2 %v232_v22 }
  0x47   : > { %369 = vmatmul.f32.vlgmr.msrb.gmra.mxu3 %v233_v27 }
  0x48   : > { %414 = vmatmul.f32.vlgmr.msrb.gmra.mxu0 %v231_v16  ;;  %449 = vmatmul.f32.vlgmr.msrb.gmra.mxu1 %v231_v16 }
  0x4e   : > { %334 = vmatmul.f32.gmra.mxu2 %v240_v24  ;;  %v1422_v24 = vand.u32 4294901760, %v1415_v12 }
  0x4f   : > { %375 = vmatmul.f32.gmra.mxu3 %v241_v34 }
  0x50   : > { %418 = vmatmul.f32.gmra.mxu0 %v239_v18  ;;  %453 = vmatmul.f32.gmra.mxu1 %v239_v18  ;;  %v510_v33 = vsub.f32 %v1415_v12, %v1422_v24 }
  0x56   : > { %339 = vmatmul.f32.gmra.mxu2 %v248_v17 }
  0x57   : > { %381 = vmatmul.f32.gmra.mxu3 %v249_v23  ;;  %v1419_v23 = vand.u32 4294901760, %v502_v11 }
  0x58   : > { %422 = vmatmul.f32.gmra.mxu0 %v1380_v9  ;;  %457 = vmatmul.f32.gmra.mxu1 %v1380_v9  ;;  %v467_v9 = vld [vmem:[%s1543_s1 + $0x10] sm:$0xff] }
  0x59   : > { %v476_v16 = vsel %vm200_vm0, %v467_v9, 0 }
  0x5a   : > { %v1424_v25 = vand.u32 4294901760, %v476_v16 }
  0x5c   : > { %v1435_v34 = vsub.f32 %v476_v16, %v1424_v25 }
  0x5e   : > { %344 = vmatmul.f32.gmra.mxu2 %v256_v21 }
  0x5f   : > { %387 = vmatmul.f32.gmra.mxu3 %v257_v29  ;;  %v468_v29 = vld [vmem:[%s1543_s1 + $0x18] sm:$0xff] }
  0x60   : > { %426 = vmatmul.f32.gmra.mxu0 %v255_v15  ;;  %461 = vmatmul.f32.gmra.mxu1 %v255_v15  ;;  %v479_v38 = vsel %vm200_vm0, %v468_v29, 0 }
  0xb5   : > { %v237_v40 = vpop.f32.mrf.mxu0  ;;  %v292_v41 = vpop.f32.mrf.mxu1 }
  0xb6   : > { %v293_v51 = vadd.f32 %v292_v41, %v237_v40 }
  0xb9   : > { %v253_v42 = vpop.f32.mrf.mxu2 }
  0xba   : > { %v300_v43 = vpop.f32.mrf.mxu3 }
  0xbb   : > { %v301_v13 = vadd.f32 %v300_v43, %v253_v42 }
  0xbd   : > { %v245_v44 = vpop.f32.mrf.mxu0  ;;  %v296_v45 = vpop.f32.mrf.mxu1 }
  0xbe   : > { %v297_v62 = vadd.f32 %v296_v45, %v245_v44  ;;  %v511_v44 = vand.u32 4294901760, %v510_v33  ;;  %v1441_v45 = vand.u32 4294901760, %v1435_v34 }
  0xc0   : > { %v518_v52 = vsub.f32 %v1435_v34, %v1441_v45 }
  0xc1   : > { %v261_v46 = vpop.f32.mrf.mxu2 }
  0xc2   : > { %v304_v47 = vpop.f32.mrf.mxu3  ;;  %v519_v58 = vand.u32 4294901760, %v518_v52 }
  0xc3   : > { %v305_v32 = vadd.f32 %v304_v47, %v261_v46  ;;  %v1443_v46 = vand.u32 4294901760, %v479_v38 }
  0xc5   : > { %v415_v48 = vpop.f32.mrf.mxu0  ;;  %v450_v50 = vpop.f32.mrf.mxu1 }
  0xc9   : > { %v330_v53 = vpop.f32.mrf.mxu2 }
  0xca   : > { %v331_v54 = vadd.f32 %v330_v53, %v293_v51  ;;  %v370_v55 = vpop.f32.mrf.mxu3  ;;  %v1448_v53 = vsub.f32 %v479_v38, %v1443_v46 }
  0xcc   : > { %v371_v57 = vadd.f32 %v370_v55, %v331_v54 }
  0xcd   : > { %v419_v60 = vpop.f32.mrf.mxu0  ;;  %v454_v2 = vpop.f32.mrf.mxu1 }
  0xce   : > { %v416_v59 = vadd.f32 %v415_v48, %v371_v57 }
  0xd0   : > { %v451_v63 = vadd.f32 %v450_v50, %v416_v59  ;;  %v525_v59 = vand.u32 4294901760, %v1448_v53 }
  0xd1   : > { %v335_v1 = vpop.f32.mrf.mxu2 }
  0xd2   : > { %v336_v3 = vadd.f32 %v335_v1, %v297_v62  ;;  %v376_v4 = vpop.f32.mrf.mxu3  ;;  %v1407_v7 = vand.u32 4294901760, %v451_v63  ;;  %v526_v0 = vsub.f32 %v1448_v53, %v525_v59 }
  0xd4   : > { %v377_v8 = vadd.f32 %v376_v4, %v336_v3  ;;  %v553_v14 = vsub.f32 %v451_v63, %v1407_v7  ;;  %v527_v4 = vand.u32 4294901760, %v526_v0 }
  0xd5   : > { %v423_v18 = vpop.f32.mrf.mxu0  ;;  %v458_v22 = vpop.f32.mrf.mxu1 }
  0xd6   : > { %v420_v10 = vadd.f32 %v419_v60, %v377_v8  ;;  %v554_v28 = vand.u32 4294901760, %v553_v14 }
  0xd8   : > { %v455_v15 = vadd.f32 %v454_v2, %v420_v10  ;;  %v555_v37 = vsub.f32 %v553_v14, %v554_v28 }
  0xd9   : > { %v340_v17 = vpop.f32.mrf.mxu2 }
  0xda   : > { %v495_v19 = vand.u32 4294901760, %v455_v15  ;;  %v341_v20 = vadd.f32 %v340_v17, %v301_v13  ;;  %v382_v21 = vpop.f32.mrf.mxu3  ;;  %v556_v49 = vand.u32 4294901760, %v555_v37 }
  0xdc   : > { %v547_v26 = vsub.f32 %v455_v15, %v495_v19  ;;  %v383_v27 = vadd.f32 %v382_v21, %v341_v20  ;;  %496 = vmatpush.msra.mxu2 %v495_v19  ;;  %631 = vmatpush.msra.mxu1 %v495_v19 }
  0xdd   : > { %v427_v43 = vpop.f32.mrf.mxu0  ;;  %v462_v50 = vpop.f32.mrf.mxu1 }
  0xde   : > { %v548_v30 = vand.u32 4294901760, %v547_v26  ;;  %v424_v31 = vadd.f32 %v423_v18, %v383_v27  ;;  %498 = vmatpush.msra.mxu2 %v1407_v7  ;;  %591 = vmatpush.msra.mxu0 %v547_v26 }
  0xdf   : > { %633 = vmatpush.msra.mxu1 %v1407_v7  ;;  %504 = vmatmul.f32.vlgmr.msra.gmra.mxu2 %v1419_v23 }
  0xe0   : > { %v549_v35 = vsub.f32 %v547_v26, %v548_v30  ;;  %v459_v36 = vadd.f32 %v458_v22, %v424_v31  ;;  %594 = vmatpush.msra.mxu0 %v553_v14  ;;  %676 = vmatpush.msrb.mxu2 %v548_v30 }
  0xe1   : > { %v345_v39 = vpop.f32.mrf.mxu2  ;;  %597 = vmatmul.f32.vlgmr.msra.gmra.mxu0 %v1399_v61  ;;  %637 = vmatmul.f32.vlgmr.msra.gmra.mxu1 %v1403_v5 }
  0xe2   : > { %v346_v40 = vadd.f32 %v345_v39, %v305_v32  ;;  %680 = vmatpush.msrb.mxu2 %v554_v28  ;;  %v550_v41 = vand.u32 4294901760, %v549_v35  ;;  %v388_v42 = vpop.f32.mrf.mxu3  ;;  %v749_v47 = vand.u32 4294901760, %v459_v36 }
  0xe4   : > { %v389_v48 = vadd.f32 %v388_v42, %v346_v40  ;;  %551 = vmatpush.msra.mxu3 %v550_v41  ;;  %v805_v54 = vsub.f32 %v459_v36, %v749_v47 }
  0xe6   : > { %v428_v51 = vadd.f32 %v427_v43, %v389_v48  ;;  %557 = vmatpush.msra.mxu3 %v556_v49  ;;  %v806_v62 = vand.u32 4294901760, %v805_v54 }
  0xe7   : > { %512 = vmatmul.f32.gmra.mxu2 %v511_v44  ;;  %559 = vmatmul.f32.vlgmr.msra.gmra.mxu3 %v1393_v56 }
  0xe8   : > { %713 = vmatpush.msrb.mxu3 %v495_v19  ;;  %v463_v55 = vadd.f32 %v462_v50, %v428_v51  ;;  %v807_v2 = vsub.f32 %v805_v54, %v806_v62 }
  0xe9   : > { %602 = vmatmul.f32.gmra.mxu0 %v1415_v12  ;;  %643 = vmatmul.f32.gmra.mxu1 %v1422_v24 }
  0xea   : > { %715 = vmatpush.msrb.mxu3 %v1407_v7  ;;  %v747_v57 = vand.u32 4294901760, %v463_v55  ;;  %v808_v7 = vand.u32 4294901760, %v807_v2 }
  0xec   : > { %v799_v60 = vsub.f32 %v463_v55, %v747_v57  ;;  %748 = vmatpush.msrb.mxu0 %v747_v57  ;;  %883 = vmatpush.msra.mxu3 %v747_v57 }
  0xee   : > { %v800_v63 = vand.u32 4294901760, %v799_v60  ;;  %750 = vmatpush.msrb.mxu0 %v749_v47  ;;  %843 = vmatpush.msra.mxu2 %v799_v60 }
  0xef   : > { %885 = vmatpush.msra.mxu3 %v749_v47  ;;  %520 = vmatmul.f32.gmra.mxu2 %v519_v58 }
  0xf0   : > { %v801_v1 = vsub.f32 %v799_v60, %v800_v63  ;;  %846 = vmatpush.msra.mxu2 %v805_v54  ;;  %928 = vmatpush.msra.mxu0 %v800_v63 }
  0xf1   : > { %563 = vmatmul.f32.gmra.mxu3 %v1405_v6  ;;  %607 = vmatmul.f32.gmra.mxu0 %v1435_v34 }
  0xf2   : > { %932 = vmatpush.msra.mxu0 %v806_v62  ;;  %v802_v3 = vand.u32 4294901760, %v801_v1  ;;  %649 = vmatmul.f32.gmra.mxu1 %v1441_v45 }
  0xf4   : > { %803 = vmatpush.msrb.mxu1 %v802_v3 }
  0xf6   : > { %809 = vmatpush.msrb.mxu1 %v808_v7 }
  0xf7   : > { %528 = vmatmul.f32.gmra.mxu2 %v527_v4 }
  0xf8   : > { %965 = vmatpush.msra.mxu1 %v747_v57 }
  0xf9   : > { %567 = vmatmul.f32.gmra.mxu3 %v1424_v25  ;;  %612 = vmatmul.f32.gmra.mxu0 %v1448_v53 }
  0xfa   : > { %967 = vmatpush.msra.mxu1 %v749_v47 }
  0xfb   : > { %655 = vmatmul.f32.gmra.mxu1 %v525_v59 }
  0xff   : > { %682 = vmatmul.f32.vlgmr.msrb.gmra.mxu2 %v1393_v56 }
 0x101   : > { %571 = vmatmul.f32.gmra.mxu3 %v1443_v46  ;;  %756 = vmatmul.f32.vlgmr.msrb.gmra.mxu0 %v1419_v23 }
 0x103   : > { %811 = vmatmul.f32.vlgmr.msrb.gmra.mxu1 %v1393_v56 }
 0x107   : > { %686 = vmatmul.f32.gmra.mxu2 %v1405_v6 }
 0x109   : > { %717 = vmatmul.f32.vlgmr.msrb.gmra.mxu3 %v1393_v56  ;;  %764 = vmatmul.f32.gmra.mxu0 %v511_v44 }
 0x10b   : > { %815 = vmatmul.f32.gmra.mxu1 %v1405_v6 }
 0x10f   : > { %690 = vmatmul.f32.gmra.mxu2 %v1424_v25 }
 0x111   : > { %721 = vmatmul.f32.gmra.mxu3 %v1405_v6  ;;  %772 = vmatmul.f32.gmra.mxu0 %v519_v58 }
 0x113   : > { %819 = vmatmul.f32.gmra.mxu1 %v1424_v25 }
 0x117   : > { %694 = vmatmul.f32.gmra.mxu2 %v1443_v46 }
 0x119   : > { %725 = vmatmul.f32.gmra.mxu3 %v1424_v25  ;;  %780 = vmatmul.f32.gmra.mxu0 %v527_v4 }
 0x11b   : > { %823 = vmatmul.f32.gmra.mxu1 %v1443_v46 }
 0x11f   : > { %849 = vmatmul.f32.vlgmr.msra.gmra.mxu2 %v1399_v61 }
 0x121   : > { %729 = vmatmul.f32.gmra.mxu3 %v1443_v46  ;;  %934 = vmatmul.f32.vlgmr.msra.gmra.mxu0 %v1393_v56 }
 0x123   : > { %969 = vmatmul.f32.vlgmr.msra.gmra.mxu1 %v1393_v56 }
 0x127   : > { %854 = vmatmul.f32.gmra.mxu2 %v1415_v12 }
 0x129   : > { %889 = vmatmul.f32.vlgmr.msra.gmra.mxu3 %v1403_v5  ;;  %938 = vmatmul.f32.gmra.mxu0 %v1405_v6 }
 0x12b   : > { %973 = vmatmul.f32.gmra.mxu1 %v1405_v6 }
 0x12f   : > { %859 = vmatmul.f32.gmra.mxu2 %v1435_v34 }
 0x131   : > { %895 = vmatmul.f32.gmra.mxu3 %v1422_v24  ;;  %942 = vmatmul.f32.gmra.mxu0 %v1424_v25 }
 0x133   : > { %977 = vmatmul.f32.gmra.mxu1 %v1424_v25 }
 0x137   : > { %864 = vmatmul.f32.gmra.mxu2 %v1448_v53 }
 0x139   : > { %901 = vmatmul.f32.gmra.mxu3 %v1441_v45  ;;  %946 = vmatmul.f32.gmra.mxu0 %v1443_v46 }
 0x13b   : > { %981 = vmatmul.f32.gmra.mxu1 %v1443_v46 }
 0x141   : > { %907 = vmatmul.f32.gmra.mxu3 %v525_v59 }
 0x15e   : > { %v598_v56 = vpop.f32.mrf.mxu0  ;;  %v638_v61 = vpop.f32.mrf.mxu1 }
 0x162   : > { %v505_v5 = vpop.f32.mrf.mxu2 }
 0x166   : > { %v603_v6 = vpop.f32.mrf.mxu0  ;;  %v644_v8 = vpop.f32.mrf.mxu1 }
 0x16a   : > { %v513_v9 = vpop.f32.mrf.mxu2  ;;  %v560_v10 = vpop.f32.mrf.mxu3 }
 0x16b   : > { %v561_v20 = vadd.f32 %v560_v10, %v505_v5 }
 0x16d   : > { %v599_v24 = vadd.f32 %v598_v56, %v561_v20 }
 0x16e   : > { %v608_v11 = vpop.f32.mrf.mxu0 }
 0x16f   : > { %v650_v12 = vpop.f32.mrf.mxu1  ;;  %v639_v26 = vadd.f32 %v638_v61, %v599_v24 }
 0x172   : > { %v521_v13 = vpop.f32.mrf.mxu2 }
 0x174   : > { %v564_v14 = vpop.f32.mrf.mxu3 }
 0x175   : > { %v565_v27 = vadd.f32 %v564_v14, %v513_v9 }
 0x176   : > { %v613_v15 = vpop.f32.mrf.mxu0 }
 0x177   : > { %v604_v32 = vadd.f32 %v603_v6, %v565_v27 }
 0x178   : > { %v656_v16 = vpop.f32.mrf.mxu1 }
 0x179   : > { %v645_v34 = vadd.f32 %v644_v8, %v604_v32 }
 0x17a   : > { %v529_v17 = vpop.f32.mrf.mxu2 }
 0x17c   : > { %v568_v18 = vpop.f32.mrf.mxu3 }
 0x17d   : > { %v569_v35 = vadd.f32 %v568_v18, %v521_v13 }
 0x17e   : > { %v757_v19 = vpop.f32.mrf.mxu0 }
 0x17f   : > { %v609_v40 = vadd.f32 %v608_v11, %v569_v35 }
 0x180   : > { %v812_v22 = vpop.f32.mrf.mxu1 }
 0x181   : > { %v651_v43 = vadd.f32 %v650_v12, %v609_v40  ;;  %v813_v60 = vadd.f32 %v812_v22, %v757_v19 }
 0x182   : > { %v683_v21 = vpop.f32.mrf.mxu2 }
 0x183   : > { %v684_v29 = vadd.f32 %v683_v21, %v639_v26 }
 0x184   : > { %v572_v23 = vpop.f32.mrf.mxu3 }
 0x185   : > { %v573_v44 = vadd.f32 %v572_v23, %v529_v17 }
 0x186   : > { %v765_v25 = vpop.f32.mrf.mxu0 }
 0x187   : > { %v614_v49 = vadd.f32 %v613_v15, %v573_v44 }
 0x188   : > { %v816_v31 = vpop.f32.mrf.mxu1 }
 0x189   : > { %v657_v52 = vadd.f32 %v656_v16, %v614_v49  ;;  %v817_v4 = vadd.f32 %v816_v31, %v765_v25 }
 0x18a   : > { %v687_v28 = vpop.f32.mrf.mxu2 }
 0x18b   : > { %v688_v38 = vadd.f32 %v687_v28, %v645_v34 }
 0x18c   : > { %v718_v30 = vpop.f32.mrf.mxu3 }
 0x18d   : > { %v719_v33 = vadd.f32 %v718_v30, %v684_v29 }
 0x18e   : > { %v773_v37 = vpop.f32.mrf.mxu0 }
 0x18f   : > { %986 = vst.msk [vmem:[%s1491_s28] sm:$0xff] %vm985_vm1, %v719_v33 }
 0x190   : > { %v820_v42 = vpop.f32.mrf.mxu1 }
 0x191   : > { %v821_v10 = vadd.f32 %v820_v42, %v773_v37 }
 0x192   : > { %v691_v36 = vpop.f32.mrf.mxu2 }
 0x193   : > { %v692_v46 = vadd.f32 %v691_v36, %v651_v43 }
 0x194   : > { %v722_v39 = vpop.f32.mrf.mxu3 }
 0x195   : > { %v723_v41 = vadd.f32 %v722_v39, %v688_v38 }
 0x196   : > { %v781_v48 = vpop.f32.mrf.mxu0 }
 0x197   : > { %987 = vst.msk [vmem:[%s1491_s28 + $0x8] sm:$0xff] %vm985_vm1, %v723_v41 }
 0x198   : > { %v824_v51 = vpop.f32.mrf.mxu1 }
 0x199   : > { %v825_v19 = vadd.f32 %v824_v51, %v781_v48 }
 0x19a   : > { %v695_v45 = vpop.f32.mrf.mxu2 }
 0x19b   : > { %v696_v54 = vadd.f32 %v695_v45, %v657_v52 }
 0x19c   : > { %v726_v47 = vpop.f32.mrf.mxu3 }
 0x19d   : > { %v727_v50 = vadd.f32 %v726_v47, %v692_v46 }
 0x19e   : > { %v935_v58 = vpop.f32.mrf.mxu0 }
 0x19f   : > { %988 = vst.msk [vmem:[%s1491_s28 + $0x10] sm:$0xff] %vm985_vm1, %v727_v50 }
 0x1a0   : > { %v970_v59 = vpop.f32.mrf.mxu1 }
 0x1a2   : > { %v850_v53 = vpop.f32.mrf.mxu2 }
 0x1a3   : > { %v851_v62 = vadd.f32 %v850_v53, %v813_v60 }
 0x1a4   : > { %v730_v55 = vpop.f32.mrf.mxu3 }
 0x1a5   : > { %v731_v57 = vadd.f32 %v730_v55, %v696_v54 }
 0x1a6   : > { %v939_v3 = vpop.f32.mrf.mxu0 }
 0x1a7   : > { %989 = vst.msk [vmem:[%s1491_s28 + $0x18] sm:$0xff] %vm985_vm1, %v731_v57 }
 0x1a8   : > { %v974_v56 = vpop.f32.mrf.mxu1 }
 0x1aa   : > { %v855_v0 = vpop.f32.mrf.mxu2 }
 0x1ab   : > { %v856_v61 = vadd.f32 %v855_v0, %v817_v4 }
 0x1ac   : > { %v890_v63 = vpop.f32.mrf.mxu3 }
 0x1ad   : > { %v891_v1 = vadd.f32 %v890_v63, %v851_v62 }
 0x1ae   : > { %v943_v12 = vpop.f32.mrf.mxu0 }
 0x1af   : > { %v936_v2 = vadd.f32 %v935_v58, %v891_v1 }
 0x1b0   : > { %v978_v15 = vpop.f32.mrf.mxu1 }
 0x1b1   : > { %v971_v7 = vadd.f32 %v970_v59, %v936_v2 }
 0x1b2   : > { %v860_v8 = vpop.f32.mrf.mxu2 }
 0x1b3   : > { %990 = vst.msk [vmem:[%s1491_s28 + $0x20] sm:$0xff] %vm985_vm1, %v971_v7  ;;  %v861_v13 = vadd.f32 %v860_v8, %v821_v10 }
 0x1b4   : > { %v896_v5 = vpop.f32.mrf.mxu3 }
 0x1b5   : > { %v897_v6 = vadd.f32 %v896_v5, %v856_v61 }
 0x1b6   : > { %v947_v23 = vpop.f32.mrf.mxu0 }
 0x1b7   : > { %v940_v9 = vadd.f32 %v939_v3, %v897_v6 }
 0x1b8   : > { %v982_v25 = vpop.f32.mrf.mxu1 }
 0x1b9   : > { %v975_v11 = vadd.f32 %v974_v56, %v940_v9 }
 0x1ba   : > { %v865_v18 = vpop.f32.mrf.mxu2 }
 0x1bb   : > { %991 = vst.msk [vmem:[%s1491_s28 + $0x28] sm:$0xff] %vm985_vm1, %v975_v11  ;;  %v866_v21 = vadd.f32 %v865_v18, %v825_v19 }
 0x1bc   : > { %v902_v14 = vpop.f32.mrf.mxu3 }
 0x1bd   : > { %v903_v16 = vadd.f32 %v902_v14, %v861_v13 }
 0x1bf   : > { %v944_v17 = vadd.f32 %v943_v12, %v903_v16 }
 0x1c1   : > { %v979_v20 = vadd.f32 %v978_v15, %v944_v17 }
 0x1c3   : > { %992 = vst.msk [vmem:[%s1491_s28 + $0x30] sm:$0xff] %vm985_vm1, %v979_v20 }
 0x1c4   : > { %v908_v22 = vpop.f32.mrf.mxu3 }
 0x1c5   : > { %v909_v24 = vadd.f32 %v908_v22, %v866_v21 }
 0x1c7   : > { %v948_v26 = vadd.f32 %v947_v23, %v909_v24 }
 0x1c9   : > { %v983_v27 = vadd.f32 %v982_v25, %v948_v26 }
 0x1cb   : > { %993 = vst.msk [vmem:[%s1491_s28 + $0x38] sm:$0xff] %vm985_vm1, %v983_v27 }
 0x1cc   : > { %1215 = shalt.err (!%p1212_p4)
}
 0x1cd   : > { %s1258_s29 = smov 128   ;;  %s1259_s22 = smov 8  }
 0x1ce   : > { %1110 = dma.vmem_to_hbm [thread:$0]  (%p1329_p10), %s1009_s7, 1024, %s1011_s8, %s995_s16, %s1258_s29, %s1258_s29, %s1259_s22  }
 0x1cf PF: > { %p1121_p5 = scmp.ge.s32.totalorder %s1254_s15, 2  ;;  %s1025_s27 = sand.u32 1, %s1242_s12  }
 0x1d0   : > { %s1026_s26 = scalar_lea.sflag [#allocation4], %s1025_s27 }
 0x1d1   : > { %p1117_p7 = pnand %p1121_p5, %p1333_p11 }
 0x1d3   : > { %p1118_p8 = pneg %p1117_p7 }
 0x1d5   : > { %1237 = dma.done.wait (%p1118_p8), %s1026_s26, 1024  }
 0x1d6   : > { %1239 = vsyncadd (%p1118_p8), %s1026_s26, 4294966272  ;;  %p16_p9 = scmp.ge.s32.totalorder %s1305_s18, 6   ;;  %s1551_s12 = smov %s1246_s13 }
 0x1d7   : > { %s1552_s13 = smov %s1250_s14  ;;  %s1553_s14 = smov %s1317_s21 }
 0x1d8   : > { %s1554_s15 = smov %s1305_s18  ;;  %18 = sbr.rel (!%p16_p9) target bundleno = 5 (0x5), region = 77 }
 0x1dd   :  { %1032 = vsyncpa [#allocation3], 1 }
 0x1de   :  { %1034 = vsyncpa [#allocation3 + $0x1], 1 }
 0x1df   :  { %1035 = vsyncpa [#allocation4], 1 }
 0x1e0   :  { %1037 = vsyncpa [#allocation4 + $0x1], 1 }

// kernel: tpu_custom_call.1
= control target key start
LH: loop header
LB: loop body
LE: loop exit
PB: predicated region body
PF: predicated region fallthrough
CT: control target
= control target key end

     0   :  { %8 = vsyncpa [#allocation3], 0  ;;  %s1542_s0 = inlined_call_operand.hbm [shape: f32[8,16,16], index: 0, kind: input, shape index: {}]   ;;  %s1543_s1 = inlined_call_operand.vmem [shape: f32[32,16], index: 1, kind: input, shape index: {}]   ;;  %s1544_s2 = inlined_call_operand.vmem [shape: f32[16,32], index: 2, kind: input, shape index: {}]   ;;  %s1545_s3 = inlined_call_operand.hbm [shape: f32[8,32,32], index: 3, kind: output, shape index: {}]  }
   0x1   :  { %10 = vsyncpa [#allocation3 + $0x1], 0 }
   0x2   :  { %11 = vsyncpa [#allocation4], 0 }
   0x3   :  { %13 = vsyncpa [#allocation4 + $0x1], 0  ;;  %s1280_s12 = smov 0   ;;  %s1282_s13 = smov 0  }
   0x4   :  { %s1284_s14 = smov 0   ;;  %s1286_s15 = smov 0  }
   0x5 LB: > { %s1301_s16 = sadd.s32 4294967295, %s1254_s15   ;;  %s1084_s17 = sadd.s32 4294967294, %s1254_s15   ;;  %s1254_s15 = sphi %s1286_s15, %s1554_s15   ;;  %s1250_s14 = sphi %s1284_s14, %s1553_s14   ;;  %s1246_s13 = sphi %s1282_s13, %s1552_s13   ;;  %s1242_s12 = sphi %s1280_s12, %s1551_s12  }
   0x6   : > { %s1305_s18 = sadd.s32 1, %s1254_s15   ;;  %s26_s19 = sadd.s32 1, %s1250_s14 }
   0x7   : > { %s23_s20 = ssub.s32 %s1254_s15, %s1305_s18  ;;  %p33_p0 = scmp.ne.s32.totalorder %s1250_s14, %s1246_s13 }
   0x8   : > { %p24_p1 = scmp.eq.s32.totalorder %s23_s20, 0  ;;  %p34_p2 = scmp.eq.s32.totalorder %s1254_s15, 0 }
   0x9   : > { %p39_p3 = scmp.ne.s32.totalorder %s1246_s13, %s1242_s12  ;;  %p40_p4 = scmp.eq.s32.totalorder %s1301_s16, 0 }
   0xa   : > { %s1317_s21 = scalar_select %p24_p1, %s1250_s14, %s26_s19  }
   0xb   : > { %p1319_p5 = por %p34_p2, %p33_p0  ;;  %p1323_p6 = por %p40_p4, %p39_p3 }
   0xc   : > { %p105_p7 = scmp.eq.s32.totalorder %s1301_s16, 3  ;;  %p111_p8 = scmp.eq.s32.totalorder %s1084_s17, 3 }
   0xd   : > { %p1120_p9 = scmp.lt.s32.totalorder %s1254_s15, 4  ;;  %s137_s26 = sand.u32 1, %s1250_s14  }
   0xe   : > { %p1329_p10 = por %p105_p7, %p33_p0  ;;  %p1333_p11 = por %p111_p8, %p39_p3 }
   0xf   : > { %s1101_s27 = sshll.u32 %s1254_s15, 5  ;;  %s1087_s28 = sshll.u32 %s137_s26, 5 }
  0x10   : > { %s147_s4 = scalar_lea.hbm %s1542_s0, %s1101_s27  ;;  %s141_s6 = scalar_lea.vmem [#allocation2], %s1087_s28 }
  0x11   : > { %s148_s5 = sshll.u32 %s147_s4, 4  ;;  %s150_s7 = sshll.u32 %s141_s6, 4  ;;  %s149_s5 = int_to_ptr.hbm [resolvable:$true] %s148_s5  ;;  %s151_s7 = int_to_ptr.vmem [resolvable:$true] %s150_s7 }
  0x12   : > { %p1344_p12 = pnand %p1120_p9, %p1319_p5  ;;  %p1091_p13 = scmp.ge.s32.totalorder %s1254_s15, 1 }
  0x13   : > { %p158_p0 = scmp.lt.s32.totalorder %s1254_s15, 5  ;;  %s138_s9 = scalar_lea.sflag [#allocation3], %s137_s26 }
  0x14   : > { %s1158_s10 = sshra.s32 %s149_s5, 4  ;;  %p1162_p2 = pneg %p1344_p12  ;;  %s1159_s10 = int_to_ptr.hbm [resolvable:$true] %s1158_s10 }
  0x15   : > { %s1160_s11 = scalar_lea.hbm %s1159_s10, 32  ;;  %s1165_s20 = scalar_lea.hbm %s1542_s0, 128 }
  0x16   : > { %p1161_p1 = scmp.ne.s32.totalorder %s1159_s10, %s1160_s11  ;;  %p1166_p5 = scmp.lt.s32.totalorder %s1159_s10, %s1542_s0 }
  0x17   : > { %p1167_p7 = scmp.lt.s32.totalorder %s1165_s20, %s1160_s11 }
  0x18   : > { %p1163_p3 = pnand %p1162_p2, %p1161_p1 }
  0x19   : > { %p1168_p8 = por %p1167_p7, %p1166_p5 }
  0x1a   : > { %p1164_p4 = pneg %p1163_p3 }
  0x1c   : > { %p1169_p9 = pnand %p1168_p8, %p1164_p4 }
  0x1e   : > { %1172 = shalt.err (!%p1169_p9)
}
  0x1f   : > { %s1256_s26 = smov 128   ;;  %s1257_s28 = smov 8  }
  0x20   : > { %1115 = dma.hbm_to_vmem [thread:$0]  (!%p1344_p12), %s149_s5, 512, %s151_s7, %s138_s9, %s1256_s26, %s1256_s26, %s1257_s28  }
  0x21   : > { %p159_p1 = pnand %p1091_p13, %p158_p0 }
  0x22   : > { %s1365_s29 = sand.u32 (!%p159_p1), 1, %s1246_s13  }
  0x23   : > { %162 = sbr.rel (%p159_p1) target bundleno = 463 (0x1cf), region = 32  ;;  %s1092_s30 = sshll.u32 (!%p159_p1), %s1365_s29, 5 }
  0x24   : > { %s165_s4 = scalar_lea.sflag (!%p159_p1), [#allocation3], %s1365_s29  ;;  %s168_s6 = scalar_lea.vmem (!%p159_p1), [#allocation2], %s1092_s30 }
  0x28   : > { %1233 = dma.done.wait (%p1323_p6), %s165_s4, 512  }
  0x29   : > { %1235 = vsyncadd (%p1323_p6), %s165_s4, 4294966784  ;;  %vm200_vm0 = vcmask 130048   ;;  %v199_v0 = vld [vmem:[%s1544_s2 + $0x8] sm:$0xff]  ;;  %v198_v1 = vld [vmem:[%s1544_s2] sm:$0xff]  ;;  %s1093_s26 = sshll.u32 %s1365_s29, 6  ;;  %vm985_vm1 = vcmask 261120  }
  0x2a   : > { %v196_v2 = vld [vmem:[%s168_s6 + $0x10] sm:$0xff]  ;;  %v227_v3 = vand.u32 4294901760, %v199_v0  ;;  %v229_v4 = vand.u32 4294901760, %v198_v1  ;;  %v197_v6 = vld [vmem:[%s168_s6 + $0x18] sm:$0xff]  ;;  %v194_v7 = vld [vmem:[%s168_s6] sm:$0xff]  ;;  %s1491_s28 = scalar_lea.vmem [#allocation5], %s1093_s26 }
  0x2b   : > { %v208_v5 = vsel %vm200_vm0, %v196_v2, 0  ;;  %v195_v8 = vld [vmem:[%s168_s6 + $0x8] sm:$0xff]  ;;  %v211_v10 = vsel %vm200_vm0, %v197_v6, 0  ;;  %v202_v11 = vsel %vm200_vm0, %v194_v7, 0  ;;  %v465_v49 = vld [vmem:[%s1543_s1] sm:$0xff]  ;;  %s1103_s30 = sshll.u32 %s1301_s16, 6 }
  0x2c   : > { %v1380_v9 = vand.u32 4294901760, %v208_v5  ;;  %v205_v12 = vsel %vm200_vm0, %v195_v8, 0  ;;  %1104 = vmatpush.msra.mxu2 %v227_v3  ;;  %v279_v13 = vsub.f32 %v199_v0, %v227_v3  ;;  %v285_v14 = vsub.f32 %v198_v1, %v229_v4  ;;  %228 = vmatpush.msra.mxu0 %v227_v3  ;;  %v466_v58 = vld [vmem:[%s1543_s1 + $0x8] sm:$0xff]  ;;  %s1007_s5 = scalar_lea.hbm %s1545_s3, %s1103_s30  ;;  %s1008_s7 = sshll.u32 %s1491_s28, 4  ;;  %s1009_s7 = int_to_ptr.vmem [resolvable:$true] %s1008_s7 }
  0x2d   : > { %v255_v15 = vand.u32 4294901760, %v211_v10  ;;  %v231_v16 = vand.u32 4294901760, %v202_v11  ;;  %v239_v18 = vand.u32 4294901760, %v205_v12  ;;  %v470_v52 = vsel %vm200_vm0, %v465_v49, 0  ;;  %s1010_s8 = sshll.u32 %s1007_s5, 4  ;;  %s995_s16 = scalar_lea.sflag [#allocation4], %s1365_s29  ;;  %s1011_s8 = int_to_ptr.hbm [resolvable:$true] %s1010_s8 }
  0x2e   : > { %v248_v17 = vsub.f32 %v208_v5, %v1380_v9  ;;  %1105 = vmatpush.msra.mxu2 %v229_v4  ;;  %v280_v19 = vand.u32 4294901760, %v279_v13  ;;  %v286_v20 = vand.u32 4294901760, %v285_v14  ;;  %230 = vmatpush.msra.mxu0 %v229_v4  ;;  %v1393_v56 = vand.u32 4294901760, %v470_v52  ;;  %s1202_s9 = sshra.s32 %s1011_s8, 4  ;;  %s1208_s17 = scalar_lea.hbm %s1545_s3, 256  ;;  %s1203_s9 = int_to_ptr.hbm [resolvable:$true] %s1202_s9 }
  0x2f   : > { %v256_v21 = vsub.f32 %v211_v10, %v255_v15  ;;  %v232_v22 = vsub.f32 %v202_v11, %v231_v16  ;;  %v240_v24 = vsub.f32 %v205_v12, %v239_v18  ;;  %v473_v0 = vsel %vm200_vm0, %v466_v58, 0  ;;  %s1204_s23 = scalar_lea.hbm %s1203_s9, 64  ;;  %p1209_p0 = scmp.lt.s32.totalorder %s1203_s9, %s1545_s3 }
  0x30   : > { %v249_v23 = vand.u32 4294901760, %v248_v17  ;;  %323 = vmatpush.msrb.mxu2 %v279_v13  ;;  %v281_v25 = vsub.f32 %v279_v13, %v280_v19  ;;  %v287_v26 = vsub.f32 %v285_v14, %v286_v20  ;;  %408 = vmatpush.msrb.mxu0 %v280_v19  ;;  %v1399_v61 = vsub.f32 %v470_v52, %v1393_v56  ;;  %p1205_p6 = scmp.ne.s32.totalorder %s1203_s9, %s1204_s23  ;;  %p1210_p2 = scmp.lt.s32.totalorder %s1208_s17, %s1204_s23 }
  0x31   : > { %v233_v27 = vand.u32 4294901760, %v232_v22  ;;  %v257_v29 = vand.u32 4294901760, %v256_v21  ;;  %v241_v34 = vand.u32 4294901760, %v240_v24  ;;  %v1405_v6 = vand.u32 4294901760, %v473_v0 }
  0x32   : > { %v250_v28 = vsub.f32 %v248_v17, %v249_v23  ;;  %326 = vmatpush.msrb.mxu2 %v285_v14  ;;  %v282_v30 = vand.u32 4294901760, %v281_v25  ;;  %v288_v31 = vand.u32 4294901760, %v287_v26  ;;  %412 = vmatpush.msrb.mxu0 %v286_v20  ;;  %v1403_v5 = vand.u32 4294901760, %v1399_v61  ;;  %p1206_p12 = pnand %p1205_p6, %p1329_p10  ;;  %p1211_p3 = por %p1210_p2, %p1209_p0 }
  0x33   : > { %v234_v32 = vsub.f32 %v232_v22, %v233_v27  ;;  %v258_v36 = vsub.f32 %v256_v21, %v257_v29  ;;  %v242_v37 = vsub.f32 %v240_v24, %v241_v34  ;;  %v1415_v12 = vsub.f32 %v473_v0, %v1405_v6 }
  0x34   : > { %v251_v33 = vand.u32 4294901760, %v250_v28  ;;  %1106 = vmatpush.msra.mxu3 %v282_v30  ;;  %283 = vmatpush.msra.mxu1 %v282_v30  ;;  %v502_v11 = vsub.f32 %v1399_v61, %v1403_v5  ;;  %p1207_p13 = pneg %p1206_p12 }
  0x35   : > { %v235_v35 = vand.u32 4294901760, %v234_v32  ;;  %v259_v38 = vand.u32 4294901760, %v258_v36  ;;  %v243_v39 = vand.u32 4294901760, %v242_v37 }
  0x36   : > { %252 = vmatmul.f32.vlgmr.msra.gmra.mxu2 %v251_v33  ;;  %1107 = vmatpush.msra.mxu3 %v288_v31  ;;  %p1212_p4 = pnand %p1211_p3, %p1207_p13 }
  0x37   : > { %289 = vmatpush.msra.mxu1 %v288_v31  ;;  %299 = vmatmul.f32.vlgmr.msra.gmra.mxu3 %v1380_v9 }
  0x38   : > { %236 = vmatmul.f32.vlgmr.msra.gmra.mxu0 %v235_v35  ;;  %291 = vmatmul.f32.vlgmr.msra.gmra.mxu1 %v231_v16 }
  0x39   : > { %363 = vmatpush.msrb.mxu3 %v227_v3  ;;  %445 = vmatpush.msrb.mxu1 %v227_v3 }
  0x3b   : > { %365 = vmatpush.msrb.mxu3 %v229_v4  ;;  %447 = vmatpush.msrb.mxu1 %v229_v4 }
  0x3e   : > { %260 = vmatmul.f32.gmra.mxu2 %v259_v38 }
  0x3f   : > { %303 = vmatmul.f32.gmra.mxu3 %v255_v15 }
  0x40   : > { %244 = vmatmul.f32.gmra.mxu0 %v243_v39  ;;  %295 = vmatmul.f32.gmra.mxu1 %v239_v18 }
  0x46   : > { %329 = vmatmul.f32.vlgmr.msrb.gmra.mxu2 %v232_v22 }
  0x47   : > { %369 = vmatmul.f32.vlgmr.msrb.gmra.mxu3 %v233_v27 }
  0x48   : > { %414 = vmatmul.f32.vlgmr.msrb.gmra.mxu0 %v231_v16  ;;  %449 = vmatmul.f32.vlgmr.msrb.gmra.mxu1 %v231_v16 }
  0x4e   : > { %334 = vmatmul.f32.gmra.mxu2 %v240_v24  ;;  %v1422_v24 = vand.u32 4294901760, %v1415_v12 }
  0x4f   : > { %375 = vmatmul.f32.gmra.mxu3 %v241_v34 }
  0x50   : > { %418 = vmatmul.f32.gmra.mxu0 %v239_v18  ;;  %453 = vmatmul.f32.gmra.mxu1 %v239_v18  ;;  %v510_v33 = vsub.f32 %v1415_v12, %v1422_v24 }
  0x56   : > { %339 = vmatmul.f32.gmra.mxu2 %v248_v17 }
  0x57   : > { %381 = vmatmul.f32.gmra.mxu3 %v249_v23  ;;  %v1419_v23 = vand.u32 4294901760, %v502_v11 }
  0x58   : > { %422 = vmatmul.f32.gmra.mxu0 %v1380_v9  ;;  %457 = vmatmul.f32.gmra.mxu1 %v1380_v9  ;;  %v467_v9 = vld [vmem:[%s1543_s1 + $0x10] sm:$0xff] }
  0x59   : > { %v476_v16 = vsel %vm200_vm0, %v467_v9, 0 }
  0x5a   : > { %v1424_v25 = vand.u32 4294901760, %v476_v16 }
  0x5c   : > { %v1435_v34 = vsub.f32 %v476_v16, %v1424_v25 }
  0x5e   : > { %344 = vmatmul.f32.gmra.mxu2 %v256_v21 }
  0x5f   : > { %387 = vmatmul.f32.gmra.mxu3 %v257_v29  ;;  %v468_v29 = vld [vmem:[%s1543_s1 + $0x18] sm:$0xff] }
  0x60   : > { %426 = vmatmul.f32.gmra.mxu0 %v255_v15  ;;  %461 = vmatmul.f32.gmra.mxu1 %v255_v15  ;;  %v479_v38 = vsel %vm200_vm0, %v468_v29, 0 }
  0xb5   : > { %v237_v40 = vpop.f32.mrf.mxu0  ;;  %v292_v41 = vpop.f32.mrf.mxu1 }
  0xb6   : > { %v293_v51 = vadd.f32 %v292_v41, %v237_v40 }
  0xb9   : > { %v253_v42 = vpop.f32.mrf.mxu2 }
  0xba   : > { %v300_v43 = vpop.f32.mrf.mxu3 }
  0xbb   : > { %v301_v13 = vadd.f32 %v300_v43, %v253_v42 }
  0xbd   : > { %v245_v44 = vpop.f32.mrf.mxu0  ;;  %v296_v45 = vpop.f32.mrf.mxu1 }
  0xbe   : > { %v297_v62 = vadd.f32 %v296_v45, %v245_v44  ;;  %v511_v44 = vand.u32 4294901760, %v510_v33  ;;  %v1441_v45 = vand.u32 4294901760, %v1435_v34 }
  0xc0   : > { %v518_v52 = vsub.f32 %v1435_v34, %v1441_v45 }
  0xc1   : > { %v261_v46 = vpop.f32.mrf.mxu2 }
  0xc2   : > { %v304_v47 = vpop.f32.mrf.mxu3  ;;  %v519_v58 = vand.u32 4294901760, %v518_v52 }
  0xc3   : > { %v305_v32 = vadd.f32 %v304_v47, %v261_v46  ;;  %v1443_v46 = vand.u32 4294901760, %v479_v38 }
  0xc5   : > { %v415_v48 = vpop.f32.mrf.mxu0  ;;  %v450_v50 = vpop.f32.mrf.mxu1 }
  0xc9   : > { %v330_v53 = vpop.f32.mrf.mxu2 }
  0xca   : > { %v331_v54 = vadd.f32 %v330_v53, %v293_v51  ;;  %v370_v55 = vpop.f32.mrf.mxu3  ;;  %v1448_v53 = vsub.f32 %v479_v38, %v1443_v46 }
  0xcc   : > { %v371_v57 = vadd.f32 %v370_v55, %v331_v54 }
  0xcd   : > { %v419_v60 = vpop.f32.mrf.mxu0  ;;  %v454_v2 = vpop.f32.mrf.mxu1 }
  0xce   : > { %v416_v59 = vadd.f32 %v415_v48, %v371_v57 }
  0xd0   : > { %v451_v63 = vadd.f32 %v450_v50, %v416_v59  ;;  %v525_v59 = vand.u32 4294901760, %v1448_v53 }
  0xd1   : > { %v335_v1 = vpop.f32.mrf.mxu2 }
  0xd2   : > { %v336_v3 = vadd.f32 %v335_v1, %v297_v62  ;;  %v376_v4 = vpop.f32.mrf.mxu3  ;;  %v1407_v7 = vand.u32 4294901760, %v451_v63  ;;  %v526_v0 = vsub.f32 %v1448_v53, %v525_v59 }
  0xd4   : > { %v377_v8 = vadd.f32 %v376_v4, %v336_v3  ;;  %v553_v14 = vsub.f32 %v451_v63, %v1407_v7  ;;  %v527_v4 = vand.u32 4294901760, %v526_v0 }
  0xd5   : > { %v423_v18 = vpop.f32.mrf.mxu0  ;;  %v458_v22 = vpop.f32.mrf.mxu1 }
  0xd6   : > { %v420_v10 = vadd.f32 %v419_v60, %v377_v8  ;;  %v554_v28 = vand.u32 4294901760, %v553_v14 }
  0xd8   : > { %v455_v15 = vadd.f32 %v454_v2, %v420_v10  ;;  %v555_v37 = vsub.f32 %v553_v14, %v554_v28 }
  0xd9   : > { %v340_v17 = vpop.f32.mrf.mxu2 }
  0xda   : > { %v495_v19 = vand.u32 4294901760, %v455_v15  ;;  %v341_v20 = vadd.f32 %v340_v17, %v301_v13  ;;  %v382_v21 = vpop.f32.mrf.mxu3  ;;  %v556_v49 = vand.u32 4294901760, %v555_v37 }
  0xdc   : > { %v547_v26 = vsub.f32 %v455_v15, %v495_v19  ;;  %v383_v27 = vadd.f32 %v382_v21, %v341_v20  ;;  %496 = vmatpush.msra.mxu2 %v495_v19  ;;  %631 = vmatpush.msra.mxu1 %v495_v19 }
  0xdd   : > { %v427_v43 = vpop.f32.mrf.mxu0  ;;  %v462_v50 = vpop.f32.mrf.mxu1 }
  0xde   : > { %v548_v30 = vand.u32 4294901760, %v547_v26  ;;  %v424_v31 = vadd.f32 %v423_v18, %v383_v27  ;;  %498 = vmatpush.msra.mxu2 %v1407_v7  ;;  %591 = vmatpush.msra.mxu0 %v547_v26 }
  0xdf   : > { %633 = vmatpush.msra.mxu1 %v1407_v7  ;;  %504 = vmatmul.f32.vlgmr.msra.gmra.mxu2 %v1419_v23 }
  0xe0   : > { %v549_v35 = vsub.f32 %v547_v26, %v548_v30  ;;  %v459_v36 = vadd.f32 %v458_v22, %v424_v31  ;;  %594 = vmatpush.msra.mxu0 %v553_v14  ;;  %676 = vmatpush.msrb.mxu2 %v548_v30 }
  0xe1   : > { %v345_v39 = vpop.f32.mrf.mxu2  ;;  %597 = vmatmul.f32.vlgmr.msra.gmra.mxu0 %v1399_v61  ;;  %637 = vmatmul.f32.vlgmr.msra.gmra.mxu1 %v1403_v5 }
  0xe2   : > { %v346_v40 = vadd.f32 %v345_v39, %v305_v32  ;;  %680 = vmatpush.msrb.mxu2 %v554_v28  ;;  %v550_v41 = vand.u32 4294901760, %v549_v35  ;;  %v388_v42 = vpop.f32.mrf.mxu3  ;;  %v749_v47 = vand.u32 4294901760, %v459_v36 }
  0xe4   : > { %v389_v48 = vadd.f32 %v388_v42, %v346_v40  ;;  %551 = vmatpush.msra.mxu3 %v550_v41  ;;  %v805_v54 = vsub.f32 %v459_v36, %v749_v47 }
  0xe6   : > { %v428_v51 = vadd.f32 %v427_v43, %v389_v48  ;;  %557 = vmatpush.msra.mxu3 %v556_v49  ;;  %v806_v62 = vand.u32 4294901760, %v805_v54 }
  0xe7   : > { %512 = vmatmul.f32.gmra.mxu2 %v511_v44  ;;  %559 = vmatmul.f32.vlgmr.msra.gmra.mxu3 %v1393_v56 }
  0xe8   : > { %713 = vmatpush.msrb.mxu3 %v495_v19  ;;  %v463_v55 = vadd.f32 %v462_v50, %v428_v51  ;;  %v807_v2 = vsub.f32 %v805_v54, %v806_v62 }
  0xe9   : > { %602 = vmatmul.f32.gmra.mxu0 %v1415_v12  ;;  %643 = vmatmul.f32.gmra.mxu1 %v1422_v24 }
  0xea   : > { %715 = vmatpush.msrb.mxu3 %v1407_v7  ;;  %v747_v57 = vand.u32 4294901760, %v463_v55  ;;  %v808_v7 = vand.u32 4294901760, %v807_v2 }
  0xec   : > { %v799_v60 = vsub.f32 %v463_v55, %v747_v57  ;;  %748 = vmatpush.msrb.mxu0 %v747_v57  ;;  %883 = vmatpush.msra.mxu3 %v747_v57 }
  0xee   : > { %v800_v63 = vand.u32 4294901760, %v799_v60  ;;  %750 = vmatpush.msrb.mxu0 %v749_v47  ;;  %843 = vmatpush.msra.mxu2 %v799_v60 }
  0xef   : > { %885 = vmatpush.msra.mxu3 %v749_v47  ;;  %520 = vmatmul.f32.gmra.mxu2 %v519_v58 }
  0xf0   : > { %v801_v1 = vsub.f32 %v799_v60, %v800_v63  ;;  %846 = vmatpush.msra.mxu2 %v805_v54  ;;  %928 = vmatpush.msra.mxu0 %v800_v63 }
  0xf1   : > { %563 = vmatmul.f32.gmra.mxu3 %v1405_v6  ;;  %607 = vmatmul.f32.gmra.mxu0 %v1435_v34 }
  0xf2   : > { %932 = vmatpush.msra.mxu0 %v806_v62  ;;  %v802_v3 = vand.u32 4294901760, %v801_v1  ;;  %649 = vmatmul.f32.gmra.mxu1 %v1441_v45 }
  0xf4   : > { %803 = vmatpush.msrb.mxu1 %v802_v3 }
  0xf6   : > { %809 = vmatpush.msrb.mxu1 %v808_v7 }
  0xf7   : > { %528 = vmatmul.f32.gmra.mxu2 %v527_v4 }
  0xf8   : > { %965 = vmatpush.msra.mxu1 %v747_v57 }
  0xf9   : > { %567 = vmatmul.f32.gmra.mxu3 %v1424_v25  ;;  %612 = vmatmul.f32.gmra.mxu0 %v1448_v53 }
  0xfa   : > { %967 = vmatpush.msra.mxu1 %v749_v47 }
  0xfb   : > { %655 = vmatmul.f32.gmra.mxu1 %v525_v59 }
  0xff   : > { %682 = vmatmul.f32.vlgmr.msrb.gmra.mxu2 %v1393_v56 }
 0x101   : > { %571 = vmatmul.f32.gmra.mxu3 %v1443_v46  ;;  %756 = vmatmul.f32.vlgmr.msrb.gmra.mxu0 %v1419_v23 }
 0x103   : > { %811 = vmatmul.f32.vlgmr.msrb.gmra.mxu1 %v1393_v56 }
 0x107   : > { %686 = vmatmul.f32.gmra.mxu2 %v1405_v6 }
 0x109   : > { %717 = vmatmul.f32.vlgmr.msrb.gmra.mxu3 %v1393_v56  ;;  %764 = vmatmul.f32.gmra.mxu0 %v511_v44 }
 0x10b   : > { %815 = vmatmul.f32.gmra.mxu1 %v1405_v6 }
 0x10f   : > { %690 = vmatmul.f32.gmra.mxu2 %v1424_v25 }
 0x111   : > { %721 = vmatmul.f32.gmra.mxu3 %v1405_v6  ;;  %772 = vmatmul.f32.gmra.mxu0 %v519_v58 }
 0x113   : > { %819 = vmatmul.f32.gmra.mxu1 %v1424_v25 }
 0x117   : > { %694 = vmatmul.f32.gmra.mxu2 %v1443_v46 }
 0x119   : > { %725 = vmatmul.f32.gmra.mxu3 %v1424_v25  ;;  %780 = vmatmul.f32.gmra.mxu0 %v527_v4 }
 0x11b   : > { %823 = vmatmul.f32.gmra.mxu1 %v1443_v46 }
 0x11f   : > { %849 = vmatmul.f32.vlgmr.msra.gmra.mxu2 %v1399_v61 }
 0x121   : > { %729 = vmatmul.f32.gmra.mxu3 %v1443_v46  ;;  %934 = vmatmul.f32.vlgmr.msra.gmra.mxu0 %v1393_v56 }
 0x123   : > { %969 = vmatmul.f32.vlgmr.msra.gmra.mxu1 %v1393_v56 }
 0x127   : > { %854 = vmatmul.f32.gmra.mxu2 %v1415_v12 }
 0x129   : > { %889 = vmatmul.f32.vlgmr.msra.gmra.mxu3 %v1403_v5  ;;  %938 = vmatmul.f32.gmra.mxu0 %v1405_v6 }
 0x12b   : > { %973 = vmatmul.f32.gmra.mxu1 %v1405_v6 }
 0x12f   : > { %859 = vmatmul.f32.gmra.mxu2 %v1435_v34 }
 0x131   : > { %895 = vmatmul.f32.gmra.mxu3 %v1422_v24  ;;  %942 = vmatmul.f32.gmra.mxu0 %v1424_v25 }
 0x133   : > { %977 = vmatmul.f32.gmra.mxu1 %v1424_v25 }
 0x137   : > { %864 = vmatmul.f32.gmra.mxu2 %v1448_v53 }
 0x139   : > { %901 = vmatmul.f32.gmra.mxu3 %v1441_v45  ;;  %946 = vmatmul.f32.gmra.mxu0 %v1443_v46 }
 0x13b   : > { %981 = vmatmul.f32.gmra.mxu1 %v1443_v46 }
 0x141   : > { %907 = vmatmul.f32.gmra.mxu3 %v525_v59 }
 0x15e   : > { %v598_v56 = vpop.f32.mrf.mxu0  ;;  %v638_v61 = vpop.f32.mrf.mxu1 }
 0x162   : > { %v505_v5 = vpop.f32.mrf.mxu2 }
 0x166   : > { %v603_v6 = vpop.f32.mrf.mxu0  ;;  %v644_v8 = vpop.f32.mrf.mxu1 }
 0x16a   : > { %v513_v9 = vpop.f32.mrf.mxu2  ;;  %v560_v10 = vpop.f32.mrf.mxu3 }
 0x16b   : > { %v561_v20 = vadd.f32 %v560_v10, %v505_v5 }
 0x16d   : > { %v599_v24 = vadd.f32 %v598_v56, %v561_v20 }
 0x16e   : > { %v608_v11 = vpop.f32.mrf.mxu0 }
 0x16f   : > { %v650_v12 = vpop.f32.mrf.mxu1  ;;  %v639_v26 = vadd.f32 %v638_v61, %v599_v24 }
 0x172   : > { %v521_v13 = vpop.f32.mrf.mxu2 }
 0x174   : > { %v564_v14 = vpop.f32.mrf.mxu3 }
 0x175   : > { %v565_v27 = vadd.f32 %v564_v14, %v513_v9 }
 0x176   : > { %v613_v15 = vpop.f32.mrf.mxu0 }
 0x177   : > { %v604_v32 = vadd.f32 %v603_v6, %v565_v27 }
 0x178   : > { %v656_v16 = vpop.f32.mrf.mxu1 }
 0x179   : > { %v645_v34 = vadd.f32 %v644_v8, %v604_v32 }
 0x17a   : > { %v529_v17 = vpop.f32.mrf.mxu2 }
 0x17c   : > { %v568_v18 = vpop.f32.mrf.mxu3 }
 0x17d   : > { %v569_v35 = vadd.f32 %v568_v18, %v521_v13 }
 0x17e   : > { %v757_v19 = vpop.f32.mrf.mxu0 }
 0x17f   : > { %v609_v40 = vadd.f32 %v608_v11, %v569_v35 }
 0x180   : > { %v812_v22 = vpop.f32.mrf.mxu1 }
 0x181   : > { %v651_v43 = vadd.f32 %v650_v12, %v609_v40  ;;  %v813_v60 = vadd.f32 %v812_v22, %v757_v19 }
 0x182   : > { %v683_v21 = vpop.f32.mrf.mxu2 }
 0x183   : > { %v684_v29 = vadd.f32 %v683_v21, %v639_v26 }
 0x184   : > { %v572_v23 = vpop.f32.mrf.mxu3 }
 0x185   : > { %v573_v44 = vadd.f32 %v572_v23, %v529_v17 }
 0x186   : > { %v765_v25 = vpop.f32.mrf.mxu0 }
 0x187   : > { %v614_v49 = vadd.f32 %v613_v15, %v573_v44 }
 0x188   : > { %v816_v31 = vpop.f32.mrf.mxu1 }
 0x189   : > { %v657_v52 = vadd.f32 %v656_v16, %v614_v49  ;;  %v817_v4 = vadd.f32 %v816_v31, %v765_v25 }
 0x18a   : > { %v687_v28 = vpop.f32.mrf.mxu2 }
 0x18b   : > { %v688_v38 = vadd.f32 %v687_v28, %v645_v34 }
 0x18c   : > { %v718_v30 = vpop.f32.mrf.mxu3 }
 0x18d   : > { %v719_v33 = vadd.f32 %v718_v30, %v684_v29 }
 0x18e   : > { %v773_v37 = vpop.f32.mrf.mxu0 }
 0x18f   : > { %986 = vst.msk [vmem:[%s1491_s28] sm:$0xff] %vm985_vm1, %v719_v33 }
 0x190   : > { %v820_v42 = vpop.f32.mrf.mxu1 }
 0x191   : > { %v821_v10 = vadd.f32 %v820_v42, %v773_v37 }
 0x192   : > { %v691_v36 = vpop.f32.mrf.mxu2 }
 0x193   : > { %v692_v46 = vadd.f32 %v691_v36, %v651_v43 }
 0x194   : > { %v722_v39 = vpop.f32.mrf.mxu3 }
 0x195   : > { %v723_v41 = vadd.f32 %v722_v39, %v688_v38 }
 0x196   : > { %v781_v48 = vpop.f32.mrf.mxu0 }
 0x197   : > { %987 = vst.msk [vmem:[%s1491_s28 + $0x8] sm:$0xff] %vm985_vm1, %v723_v41 }
 0x198   : > { %v824_v51 = vpop.f32.mrf.mxu1 }
 0x199   : > { %v825_v19 = vadd.f32 %v824_v51, %v781_v48 }
 0x19a   : > { %v695_v45 = vpop.f32.mrf.mxu2 }
 0x19b   : > { %v696_v54 = vadd.f32 %v695_v45, %v657_v52 }
 0x19c   : > { %v726_v47 = vpop.f32.mrf.mxu3 }
 0x19d   : > { %v727_v50 = vadd.f32 %v726_v47, %v692_v46 }
 0x19e   : > { %v935_v58 = vpop.f32.mrf.mxu0 }
 0x19f   : > { %988 = vst.msk [vmem:[%s1491_s28 + $0x10] sm:$0xff] %vm985_vm1, %v727_v50 }
 0x1a0   : > { %v970_v59 = vpop.f32.mrf.mxu1 }
 0x1a2   : > { %v850_v53 = vpop.f32.mrf.mxu2 }
 0x1a3   : > { %v851_v62 = vadd.f32 %v850_v53, %v813_v60 }
 0x1a4   : > { %v730_v55 = vpop.f32.mrf.mxu3 }
 0x1a5   : > { %v731_v57 = vadd.f32 %v730_v55, %v696_v54 }
 0x1a6   : > { %v939_v3 = vpop.f32.mrf.mxu0 }
 0x1a7   : > { %989 = vst.msk [vmem:[%s1491_s28 + $0x18] sm:$0xff] %vm985_vm1, %v731_v57 }
 0x1a8   : > { %v974_v56 = vpop.f32.mrf.mxu1 }
 0x1aa   : > { %v855_v0 = vpop.f32.mrf.mxu2 }
 0x1ab   : > { %v856_v61 = vadd.f32 %v855_v0, %v817_v4 }
 0x1ac   : > { %v890_v63 = vpop.f32.mrf.mxu3 }
 0x1ad   : > { %v891_v1 = vadd.f32 %v890_v63, %v851_v62 }
 0x1ae   : > { %v943_v12 = vpop.f32.mrf.mxu0 }
 0x1af   : > { %v936_v2 = vadd.f32 %v935_v58, %v891_v1 }
 0x1b0   : > { %v978_v15 = vpop.f32.mrf.mxu1 }
 0x1b1   : > { %v971_v7 = vadd.f32 %v970_v59, %v936_v2 }
 0x1b2   : > { %v860_v8 = vpop.f32.mrf.mxu2 }
 0x1b3   : > { %990 = vst.msk [vmem:[%s1491_s28 + $0x20] sm:$0xff] %vm985_vm1, %v971_v7  ;;  %v861_v13 = vadd.f32 %v860_v8, %v821_v10 }
 0x1b4   : > { %v896_v5 = vpop.f32.mrf.mxu3 }
 0x1b5   : > { %v897_v6 = vadd.f32 %v896_v5, %v856_v61 }
 0x1b6   : > { %v947_v23 = vpop.f32.mrf.mxu0 }
 0x1b7   : > { %v940_v9 = vadd.f32 %v939_v3, %v897_v6 }
 0x1b8   : > { %v982_v25 = vpop.f32.mrf.mxu1 }
 0x1b9   : > { %v975_v11 = vadd.f32 %v974_v56, %v940_v9 }
 0x1ba   : > { %v865_v18 = vpop.f32.mrf.mxu2 }
 0x1bb   : > { %991 = vst.msk [vmem:[%s1491_s28 + $0x28] sm:$0xff] %vm985_vm1, %v975_v11  ;;  %v866_v21 = vadd.f32 %v865_v18, %v825_v19 }
 0x1bc   : > { %v902_v14 = vpop.f32.mrf.mxu3 }
 0x1bd   : > { %v903_v16 = vadd.f32 %v902_v14, %v861_v13 }
 0x1bf   : > { %v944_v17 = vadd.f32 %v943_v12, %v903_v16 }
 0x1c1   : > { %v979_v20 = vadd.f32 %v978_v15, %v944_v17 }
 0x1c3   : > { %992 = vst.msk [vmem:[%s1491_s28 + $0x30] sm:$0xff] %vm985_vm1, %v979_v20 }
 0x1c4   : > { %v908_v22 = vpop.f32.mrf.mxu3 }
 0x1c5   : > { %v909_v24 = vadd.f32 %v908_v22, %v866_v21 }
 0x1c7   : > { %v948_v26 = vadd.f32 %v947_v23, %v909_v24 }
 0x1c9   : > { %v983_v27 = vadd.f32 %v982_v25, %v948_v26 }
 0x1cb   : > { %993 = vst.msk [vmem:[%s1491_s28 + $0x38] sm:$0xff] %vm985_vm1, %v983_v27 }
 0x1cc   : > { %1215 = shalt.err (!%p1212_p4)
}
 0x1cd   : > { %s1258_s29 = smov 128   ;;  %s1259_s22 = smov 8  }
 0x1ce   : > { %1110 = dma.vmem_to_hbm [thread:$0]  (%p1329_p10), %s1009_s7, 1024, %s1011_s8, %s995_s16, %s1258_s29, %s1258_s29, %s1259_s22  }
 0x1cf PF: > { %p1121_p5 = scmp.ge.s32.totalorder %s1254_s15, 2  ;;  %s1025_s27 = sand.u32 1, %s1242_s12  }
 0x1d0   : > { %s1026_s26 = scalar_lea.sflag [#allocation4], %s1025_s27 }
 0x1d1   : > { %p1117_p7 = pnand %p1121_p5, %p1333_p11 }
 0x1d3   : > { %p1118_p8 = pneg %p1117_p7 }
 0x1d5   : > { %1237 = dma.done.wait (%p1118_p8), %s1026_s26, 1024  }
 0x1d6   : > { %1239 = vsyncadd (%p1118_p8), %s1026_s26, 4294966272  ;;  %p16_p9 = scmp.ge.s32.totalorder %s1305_s18, 6   ;;  %s1551_s12 = smov %s1246_s13 }
 0x1d7   : > { %s1552_s13 = smov %s1250_s14  ;;  %s1553_s14 = smov %s1317_s21 }
 0x1d8   : > { %s1554_s15 = smov %s1305_s18  ;;  %18 = sbr.rel (!%p16_p9) target bundleno = 5 (0x5), region = 77 }
 0x1dd   :  { %1032 = vsyncpa [#allocation3], 1 }
 0x1de   :  { %1034 = vsyncpa [#allocation3 + $0x1], 1 }
 0x1df   :  { %1035 = vsyncpa [#allocation4], 1 }
 0x1e0   :  { %1037 = vsyncpa [#allocation4 + $0x1], 1 }

</bundles_post_ra>
